<compile_context>
chip_gen: v7x
topology: tpu7x:2x2x1
jax: 0.10.0
libtpu: 0.0.40
codegen_flags: <defaults>
</compile_context>

<pallas_src>
import math

import jax
import jax.numpy as jnp
from jax.experimental import pallas as pl
from jax.experimental.pallas import tpu as pltpu

OBS_DIM = 2      # MountainCarContinuous-v0 observation_space.shape[0]
ACT_DIM = 1      # MountainCarContinuous-v0 action_space.shape[0]
HIDDEN = 20

assert ACT_DIM == 1  # layer-4 reduction below is written for a single Q output column


def qnetwork_kernel(s_ref, a_ref, w1_ref, w23_ref, w4_ref, b_ref, o_ref):
    """Fused MLP forward for one batch tile:
       (state,action) -> Linear(3,20) -> ReLU -> Linear(20,20) -> ReLU
                      -> Linear(20,20) -> ReLU -> Linear(20,1)

    - The torch.cat((state, action), 1) is folded into layer 1 (split weight rows),
      so no concatenated activation ever round-trips HBM.
    - Layer 1 (K=3) and layer 4 (N=1) run on the VPU/XLU (broadcast FMAs / lane
      reduction) instead of paying >95%-padded MXU passes; layers 2/3 stay on the MXU.
    """
    s = s_ref[...]                      # (TB, OBS_DIM)
    a = a_ref[...]                      # (TB, ACT_DIM)

    # ---- layer 1: VPU broadcast FMAs (concat fused in) ----
    h = s[:, 0:1] * w1_ref[0:1, :]
    for k in range(1, OBS_DIM):
        h = h + s[:, k:k + 1] * w1_ref[k:k + 1, :]
    for k in range(ACT_DIM):
        h = h + a[:, k:k + 1] * w1_ref[OBS_DIM + k:OBS_DIM + k + 1, :]
    h = jnp.maximum(h + b_ref[0:1, :], 0.0)                        # (TB, HIDDEN)

    # ---- layers 2 & 3: MXU ----
    h = jnp.maximum(
        jnp.dot(h, w23_ref[0], preferred_element_type=jnp.float32) + b_ref[1:2, :], 0.0)
    h = jnp.maximum(
        jnp.dot(h, w23_ref[1], preferred_element_type=jnp.float32) + b_ref[2:3, :], 0.0)

    # ---- layer 4 (N=1): VPU multiply + cross-lane reduce ----
    q = jnp.sum(h * w4_ref[0:1, :], axis=-1, keepdims=True) + b_ref[3:4, 0:1]
    o_ref[...] = q.astype(o_ref.dtype)


def make_qnetwork_params(key):
    """PyTorch-style nn.Linear init: U(-1/sqrt(fan_in), 1/sqrt(fan_in)).
    Parameters are packed into 4 arrays to cut per-input DMA/setup overhead:
      w1  : (OBS_DIM+ACT_DIM, HIDDEN)   layer-1 weight (x @ W layout)
      w23 : (2, HIDDEN, HIDDEN)         layers 2 and 3 stacked
      w4  : (ACT_DIM, HIDDEN)           layer-4 weight as a row
      b   : (4, HIDDEN)                 b1,b2,b3,b4 (b4 zero-padded to HIDDEN)
    """
    k1, k2, k3, k4 = jax.random.split(key, 4)

    def linear(k, fan_in, fan_out):
        kw, kb = jax.random.split(k)
        bound = 1.0 / math.sqrt(fan_in)
        w = jax.random.uniform(kw, (fan_in, fan_out), jnp.float32, -bound, bound)
        b = jax.random.uniform(kb, (fan_out,), jnp.float32, -bound, bound)
        return w, b

    w1, b1 = linear(k1, OBS_DIM + ACT_DIM, HIDDEN)
    w2, b2 = linear(k2, HIDDEN, HIDDEN)
    w3, b3 = linear(k3, HIDDEN, HIDDEN)
    w4, b4 = linear(k4, HIDDEN, ACT_DIM)            # (HIDDEN, ACT_DIM)

    w23 = jnp.stack([w2, w3], axis=0)               # (2, H, H)
    w4_row = w4.T                                   # (ACT_DIM, HIDDEN)
    b4_pad = jnp.zeros((HIDDEN,), jnp.float32).at[:ACT_DIM].set(b4)
    b = jnp.stack([b1, b2, b3, b4_pad], axis=0)     # (4, H)
    return w1, w23, w4_row, b


@jax.jit
def qnetwork_forward(state, action, params):
    """Equivalent of Qnetwork.forward(state, action)."""
    w1, w23, w4, b = params
    state = state.astype(jnp.float32)
    action = action.astype(jnp.float32)
    batch = state.shape[0]

    # Batch grid: stream (state, action, out) tiles, weights are grid-invariant
    # (index_map -> 0) so they are DMA'd once and stay resident.
    # TB=512 keeps double-buffered tiles (~few hundred KiB) far below every scoped
    # VMEM default (16 MiB v5e, 32 MiB v6e/v7x; 64 MiB physical on v7x), so the
    # kernel is portable and there is no VMEM cliff at large batch.
    tb = min(512, batch)
    grid = (pl.cdiv(batch, tb),)

    return pl.pallas_call(
        qnetwork_kernel,
        out_shape=jax.ShapeDtypeStruct((batch, ACT_DIM), jnp.float32),
        grid=grid,
        in_specs=[
            pl.BlockSpec((tb, OBS_DIM), lambda i: (i, 0)),
            pl.BlockSpec((tb, ACT_DIM), lambda i: (i, 0)),
            pl.BlockSpec((OBS_DIM + ACT_DIM, HIDDEN), lambda i: (0, 0)),
            pl.BlockSpec((2, HIDDEN, HIDDEN), lambda i: (0, 0, 0)),
            pl.BlockSpec((ACT_DIM, HIDDEN), lambda i: (0, 0)),
            pl.BlockSpec((4, HIDDEN), lambda i: (0, 0)),
        ],
        out_specs=pl.BlockSpec((tb, ACT_DIM), lambda i: (i, 0)),
        # Batch axis is embarrassingly parallel -> sharded across both TCs on v7x,
        # harmless on single-TC v5e/v6e.
        compiler_params=pltpu.CompilerParams(dimension_semantics=("parallel",)),
    )(state, action, w1, w23, w4, b)


def qnetwork_reference(state, action, params):
    """Pure-JAX reference (matches the PyTorch module semantics)."""
    w1, w23, w4, b = params
    x = jnp.concatenate([state.astype(jnp.float32), action.astype(jnp.float32)], axis=1)
    h = jnp.maximum(x @ w1 + b[0], 0.0)
    h = jnp.maximum(h @ w23[0] + b[1], 0.0)
    h = jnp.maximum(h @ w23[1] + b[2], 0.0)
    return h @ w4.T + b[3, :ACT_DIM]


if __name__ == "__main__":
    key = jax.random.PRNGKey(0)
    k_params, k_state, k_action, k_state2, k_action2 = jax.random.split(key, 5)

    params = make_qnetwork_params(k_params)

    # Small batch (single tile).
    batch = 8
    state = jax.random.normal(k_state, (batch, OBS_DIM), jnp.float32)
    action = jax.random.normal(k_action, (batch, ACT_DIM), jnp.float32)
    out = jax.block_until_ready(qnetwork_forward(state, action, params))
    ref = qnetwork_reference(state, action, params)
    assert out.shape == (batch, ACT_DIM)
    assert jnp.allclose(out, ref, atol=1e-5, rtol=1e-5), "mismatch vs JAX reference (batch=8)"

    # Larger batch exercises the multi-tile grid / streaming path (amortized launch cost).
    big = 1024
    state_b = jax.random.normal(k_state2, (big, OBS_DIM), jnp.float32)
    action_b = jax.random.normal(k_action2, (big, ACT_DIM), jnp.float32)
    out_b = jax.block_until_ready(qnetwork_forward(state_b, action_b, params))
    ref_b = qnetwork_reference(state_b, action_b, params)
    assert jnp.allclose(out_b, ref_b, atol=1e-5, rtol=1e-5), "mismatch vs JAX reference (batch=1024)"

    print("KERNEL_OK")
</pallas_src>

<mosaic_0001>
module attributes {stable_mosaic.version = 11 : i64} {
  func.func @qnetwork_kernel(%arg0: i32, %arg1: memref<8x2xf32, #tpu.memory_space<vmem>>, %arg2: memref<8x1xf32, #tpu.memory_space<vmem>>, %arg3: memref<3x20xf32, #tpu.memory_space<vmem>>, %arg4: memref<2x20x20xf32, #tpu.memory_space<vmem>>, %arg5: memref<1x20xf32, #tpu.memory_space<vmem>>, %arg6: memref<4x20xf32, #tpu.memory_space<vmem>>, %arg7: memref<8x1xf32, #tpu.memory_space<vmem>>) attributes {dimension_semantics = [#tpu.dimension_semantics<parallel>], iteration_bounds = array<i64: 1>, scalar_prefetch = 0 : i64, scratch_operands = 0 : i64, tpu.core_type = #tpu.core_type<tc>, window_params = [{transform_indices = @transform_0, window_bounds = array<i64: 8, 2>}, {transform_indices = @transform_1, window_bounds = array<i64: 8, 1>}, {pipeline_mode = #tpu.pipeline_mode<synchronous>, transform_indices = @transform_2, window_bounds = array<i64: 3, 20>}, {pipeline_mode = #tpu.pipeline_mode<synchronous>, transform_indices = @transform_3, window_bounds = array<i64: 2, 20, 20>}, {pipeline_mode = #tpu.pipeline_mode<synchronous>, transform_indices = @transform_4, window_bounds = array<i64: 1, 20>}, {pipeline_mode = #tpu.pipeline_mode<synchronous>, transform_indices = @transform_5, window_bounds = array<i64: 4, 20>}, {transform_indices = @transform_6, window_bounds = array<i64: 8, 1>}]} {
    %c0 = arith.constant 0 : index
    %c0_0 = arith.constant 0 : index
    %0 = vector.load %arg1[%c0, %c0_0] : memref<8x2xf32, #tpu.memory_space<vmem>>, vector<8x2xf32>
    %c0_1 = arith.constant 0 : index
    %c0_2 = arith.constant 0 : index
    %1 = vector.load %arg2[%c0_1, %c0_2] : memref<8x1xf32, #tpu.memory_space<vmem>>, vector<8x1xf32>
    %2 = vector.extract_strided_slice %0 {offsets = [0, 0], sizes = [8, 1], strides = [1, 1]} : vector<8x2xf32> to vector<8x1xf32>
    %c0_3 = arith.constant 0 : index
    %c0_4 = arith.constant 0 : index
    %3 = vector.load %arg3[%c0_3, %c0_4] : memref<3x20xf32, #tpu.memory_space<vmem>>, vector<1x20xf32>
    %4 = vector.broadcast %2 : vector<8x1xf32> to vector<8x20xf32>
    %5 = vector.broadcast %3 : vector<1x20xf32> to vector<8x20xf32>
    %6 = arith.mulf %4, %5 : vector<8x20xf32>
    %7 = vector.extract_strided_slice %0 {offsets = [0, 1], sizes = [8, 1], strides = [1, 1]} : vector<8x2xf32> to vector<8x1xf32>
    %c1 = arith.constant 1 : index
    %c0_5 = arith.constant 0 : index
    %8 = vector.load %arg3[%c1, %c0_5] : memref<3x20xf32, #tpu.memory_space<vmem>>, vector<1x20xf32>
    %9 = vector.broadcast %7 : vector<8x1xf32> to vector<8x20xf32>
    %10 = vector.broadcast %8 : vector<1x20xf32> to vector<8x20xf32>
    %11 = arith.mulf %9, %10 : vector<8x20xf32>
    %12 = arith.addf %6, %11 : vector<8x20xf32>
    %c2 = arith.constant 2 : index
    %c0_6 = arith.constant 0 : index
    %13 = vector.load %arg3[%c2, %c0_6] : memref<3x20xf32, #tpu.memory_space<vmem>>, vector<1x20xf32>
    %14 = vector.broadcast %1 : vector<8x1xf32> to vector<8x20xf32>
    %15 = vector.broadcast %13 : vector<1x20xf32> to vector<8x20xf32>
    %16 = arith.mulf %14, %15 : vector<8x20xf32>
    %17 = arith.addf %12, %16 : vector<8x20xf32>
    %c0_7 = arith.constant 0 : index
    %c0_8 = arith.constant 0 : index
    %18 = vector.load %arg6[%c0_7, %c0_8] : memref<4x20xf32, #tpu.memory_space<vmem>>, vector<1x20xf32>
    %19 = vector.broadcast %18 : vector<1x20xf32> to vector<8x20xf32>
    %20 = arith.addf %17, %19 : vector<8x20xf32>
    %cst = arith.constant 0.000000e+00 : f32
    %21 = vector.broadcast %cst : f32 to vector<8x20xf32>
    %22 = arith.maximumf %20, %21 : vector<8x20xf32>
    %c0_9 = arith.constant 0 : index
    %c0_10 = arith.constant 0 : index
    %c0_11 = arith.constant 0 : index
    %23 = vector.load %arg4[%c0_9, %c0_10, %c0_11] : memref<2x20x20xf32, #tpu.memory_space<vmem>>, vector<1x20x20xf32>
    %24 = vector.shape_cast %23 : vector<1x20x20xf32> to vector<20x20xf32>
    %cst_12 = arith.constant dense<0.000000e+00> : vector<8x20xf32>
    %25 = tpu.matmul %22, %24, %cst_12 {dimension_numbers = #tpu.dot_dimension_numbers<[1], [0], [0], [1], [0, 0, 1, 1], [], []>} : vector<8x20xf32>, vector<20x20xf32>, vector<8x20xf32> -> vector<8x20xf32>
    %c1_13 = arith.constant 1 : index
    %c0_14 = arith.constant 0 : index
    %26 = vector.load %arg6[%c1_13, %c0_14] : memref<4x20xf32, #tpu.memory_space<vmem>>, vector<1x20xf32>
    %27 = vector.broadcast %26 : vector<1x20xf32> to vector<8x20xf32>
    %28 = arith.addf %25, %27 : vector<8x20xf32>
    %cst_15 = arith.constant 0.000000e+00 : f32
    %29 = vector.broadcast %cst_15 : f32 to vector<8x20xf32>
    %30 = arith.maximumf %28, %29 : vector<8x20xf32>
    %c1_16 = arith.constant 1 : index
    %c0_17 = arith.constant 0 : index
    %c0_18 = arith.constant 0 : index
    %31 = vector.load %arg4[%c1_16, %c0_17, %c0_18] : memref<2x20x20xf32, #tpu.memory_space<vmem>>, vector<1x20x20xf32>
    %32 = vector.shape_cast %31 : vector<1x20x20xf32> to vector<20x20xf32>
    %cst_19 = arith.constant dense<0.000000e+00> : vector<8x20xf32>
    %33 = tpu.matmul %30, %32, %cst_19 {dimension_numbers = #tpu.dot_dimension_numbers<[1], [0], [0], [1], [0, 0, 1, 1], [], []>} : vector<8x20xf32>, vector<20x20xf32>, vector<8x20xf32> -> vector<8x20xf32>
    %c2_20 = arith.constant 2 : index
    %c0_21 = arith.constant 0 : index
    %34 = vector.load %arg6[%c2_20, %c0_21] : memref<4x20xf32, #tpu.memory_space<vmem>>, vector<1x20xf32>
    %35 = vector.broadcast %34 : vector<1x20xf32> to vector<8x20xf32>
    %36 = arith.addf %33, %35 : vector<8x20xf32>
    %cst_22 = arith.constant 0.000000e+00 : f32
    %37 = vector.broadcast %cst_22 : f32 to vector<8x20xf32>
    %38 = arith.maximumf %36, %37 : vector<8x20xf32>
    %c0_23 = arith.constant 0 : index
    %c0_24 = arith.constant 0 : index
    %39 = vector.load %arg5[%c0_23, %c0_24] : memref<1x20xf32, #tpu.memory_space<vmem>>, vector<1x20xf32>
    %40 = vector.broadcast %39 : vector<1x20xf32> to vector<8x20xf32>
    %41 = arith.mulf %38, %40 : vector<8x20xf32>
    %cst_25 = arith.constant dense<0.000000e+00> : vector<8xf32>
    %42 = vector.multi_reduction <add>, %41, %cst_25 [1] : vector<8x20xf32> to vector<8xf32>
    %43 = vector.shape_cast %42 : vector<8xf32> to vector<8x1xf32>
    %c3 = arith.constant 3 : index
    %c0_26 = arith.constant 0 : index
    %44 = vector.load %arg6[%c3, %c0_26] : memref<4x20xf32, #tpu.memory_space<vmem>>, vector<1x1xf32>
    %45 = vector.broadcast %44 : vector<1x1xf32> to vector<8x1xf32>
    %46 = arith.addf %43, %45 : vector<8x1xf32>
    %c0_27 = arith.constant 0 : index
    %c0_28 = arith.constant 0 : index
    %47 = vector.load %arg7[%c0_27, %c0_28] : memref<8x1xf32, #tpu.memory_space<vmem>>, vector<8x1xf32>
    tpu.vector_store %arg7[%c0_27, %c0_28], %46 {strides = array<i32>} : memref<8x1xf32, #tpu.memory_space<vmem>>, vector<8x1xf32>,
    return
  }
  func.func @transform_0(%arg0: i32) -> (i32, i32) {
    %c0_i32 = arith.constant 0 : i32
    %c0_i32_0 = arith.constant 0 : i32
    return %arg0, %c0_i32 : i32, i32
  }
  func.func @transform_1(%arg0: i32) -> (i32, i32) {
    %c0_i32 = arith.constant 0 : i32
    %c0_i32_0 = arith.constant 0 : i32
    return %arg0, %c0_i32 : i32, i32
  }
  func.func @transform_2(%arg0: i32) -> (i32, i32) {
    %c0_i32 = arith.constant 0 : i32
    %c0_i32_0 = arith.constant 0 : i32
    %c0_i32_1 = arith.constant 0 : i32
    return %c0_i32, %c0_i32_0 : i32, i32
  }
  func.func @transform_3(%arg0: i32) -> (i32, i32, i32) {
    %c0_i32 = arith.constant 0 : i32
    %c0_i32_0 = arith.constant 0 : i32
    %c0_i32_1 = arith.constant 0 : i32
    %c0_i32_2 = arith.constant 0 : i32
    return %c0_i32, %c0_i32_0, %c0_i32_1 : i32, i32, i32
  }
  func.func @transform_4(%arg0: i32) -> (i32, i32) {
    %c0_i32 = arith.constant 0 : i32
    %c0_i32_0 = arith.constant 0 : i32
    %c0_i32_1 = arith.constant 0 : i32
    return %c0_i32, %c0_i32_0 : i32, i32
  }
  func.func @transform_5(%arg0: i32) -> (i32, i32) {
    %c0_i32 = arith.constant 0 : i32
    %c0_i32_0 = arith.constant 0 : i32
    %c0_i32_1 = arith.constant 0 : i32
    return %c0_i32, %c0_i32_0 : i32, i32
  }
  func.func @transform_6(%arg0: i32) -> (i32, i32) {
    %c0_i32 = arith.constant 0 : i32
    %c0_i32_0 = arith.constant 0 : i32
    return %arg0, %c0_i32 : i32, i32
  }
}

</mosaic_0001>

<bundles_post_ra>
// kernel: qnetwork_forward.1
= control target key start
LH: loop header
LB: loop body
LE: loop exit
PB: predicated region body
PF: predicated region fallthrough
CT: control target
= control target key end

     0   :  { %v318_v0 = vmov 0   ;;  %v319_v3 = vmov 1   ;;  %v320_v7 = vmov 0.0|0.0   ;;  %v321_v8 = vmov 0.0   ;;  %s414_s0 = inlined_call_operand.vmem [shape: f32[8,2], index: 0, kind: input, shape index: {}]   ;;  %s415_s1 = inlined_call_operand.vmem [shape: f32[8,1], index: 1, kind: input, shape index: {}]   ;;  %s416_s3 = inlined_call_operand.vmem [shape: f32[2,20,20], index: 3, kind: input, shape index: {}]   ;;  %s417_s2 = inlined_call_operand.vmem [shape: f32[3,20], index: 2, kind: input, shape index: {}]   ;;  %s418_s5 = inlined_call_operand.vmem [shape: f32[4,20], index: 5, kind: input, shape index: {}]   ;;  %s419_s4 = inlined_call_operand.vmem [shape: f32[1,20], index: 4, kind: input, shape index: {}]   ;;  %s420_s6 = inlined_call_operand.vmem [shape: f32[8,1], index: 6, kind: output, shape index: {}]  }
   0x1   :  { %314 = vset.pattern.permute.xlu0 %v318_v0  ;;  %v23_v1 = vld [vmem:[%s414_s0] sm:$0xff]  ;;  %316 = vset.pattern.permute.xlu1 %v318_v0  ;;  %v67_v5 = vld [vmem:[%s416_s3 + $0x8] sm:$0xff]  ;;  %v68_v9 = vld [vmem:[%s416_s3 + $0x10] sm:$0xf]  ;;  %vm78_vm0 = vcmask 1043456   ;;  %vm322_vm1 = vmmov 0  }
   0x2   :  { %v24_v2 = vld [vmem:[%s415_s1] sm:$0xff]  ;;  %28 = vperm.xlu0 %314, %v23_v1   ;;  %303 = vmatprep.subr.bf16.mxu0 %v320_v7  ;;  %vm74_vm2 = vcmask 162816   ;;  %v269_v24 = vld [vmem:[%s416_s3 + $0x18] sm:$0xff]  ;;  %v271_v27 = vld [vmem:[%s416_s3 + $0x28] sm:$0xf]  ;;  %vm256_vm3 = vcmask 7168  }
   0x3   :  { %50 = vperm.xlu1 %316, %v24_v2   ;;  %v66_v4 = vld [vmem:[%s416_s3] sm:$0xff]  ;;  %306 = vmatprep.subr.bf16.mxu1 %v320_v7 }
   0x4   :  { %v304_v6 = vpack.c.bf16 %v67_v5, %v66_v4  ;;  %291 = vmatprep.mubr.msk.f32.mxu0 %vm322_vm1, %v321_v8  ;;  %300 = vmatprep.mubr.msk.f32.mxu1 %vm322_vm1, %v321_v8  ;;  %v262_v11 = vld [vmem:[%s417_s2] ss:$0 sm:$0xff]  ;;  %v263_v12 = vld [vmem:[%s417_s2 + $0x1] ss:$0 sm:$0xff]  ;;  %v264_v13 = vld [vmem:[%s417_s2 + $0x2] ss:$0 sm:$0xff] }
   0x5   :  { %v265_v20 = vld [vmem:[%s418_s5] ss:$0 sm:$0xff]  ;;  %v266_v28 = vld [vmem:[%s418_s5 + $0x1] ss:$0 sm:$0xff]  ;;  %v272_v33 = vld [vmem:[%s418_s5 + $0x2] ss:$0 sm:$0xff] }
   0x6   :  { %315 = vset.pattern.permute.xlu0 %v319_v3  ;;  %305 = vmatpush3.bf16.msra.mxu0 %v304_v6  ;;  %v270_v25 = vld [vmem:[%s416_s3 + $0x20] sm:$0xff] }
   0x7   :  { %38 = vperm.xlu0 %315, %v23_v1   ;;  %289 = vmatprep.subr.mxu0 %v321_v8  ;;  %v307_v26 = vpack.c.bf16 %v270_v25, %v269_v24  ;;  %v275_v37 = vld [vmem:[%s419_s4] ss:$0 sm:$0xff]  ;;  %v276_v41 = vld [vmem:[%s418_s5 + $0x3] ss:$0 sm:$0xff] }
   0x9   :  { %308 = vmatpush3.bf16.msra.mxu1 %v307_v26 }
   0xa   :  { %290 = vmatpush3.msk.msra.mxu0 %vm78_vm0, %v68_v9  ;;  %298 = vmatprep.subr.mxu1 %v321_v8 }
   0xb   :  { %317 = vset.pattern.permute.xlu0 %v318_v0 }
   0xd   :  { %299 = vmatpush3.msk.msra.mxu1 %vm78_vm0, %v271_v27 }
  0x81   :  { %v29_v10 = vpop.permute.xlu0 %28 }
  0x82   :  { %v51_v14 = vpop.permute.xlu1 %50  ;;  %v35_v16 = vmul.f32 %v262_v11, %v29_v10 }
  0x83   :  { %v57_v18 = vmul.f32 %v264_v13, %v51_v14 }
  0x86   :  { %v39_v15 = vpop.permute.xlu0 %38 }
  0x87   :  { %v45_v17 = vmul.f32 %v263_v12, %v39_v15 }
  0x89   :  { %v46_v19 = vadd.f32 %v45_v17, %v35_v16 }
  0x8b   :  { %v58_v21 = vadd.f32 %v57_v18, %v46_v19 }
  0x8d   :  { %v64_v22 = vadd.f32 %v265_v20, %v58_v21 }
  0x8f   :  { %v65_v23 = vmax.f32 %v64_v22, 0.0 }
  0x91   :  { %292 = vmatmul.mubr.msk.f32.vlgmr.msra.gmra.mrb[0].mxu0 %vm74_vm2, %v65_v23 }
 0x164   :  { %v148_v29 = vpop.f32.mrb[0].mxu0 }
 0x165   :  { %v149_v30 = vadd.f32 %v266_v28, %v148_v29  ;;  %v293_v31 = vpop.f32.mrb[1].mxu0 }
 0x167   :  { %v152_v32 = vmax.f32 %v149_v30, 0.0 }
 0x169   :  { %301 = vmatmul.mubr.msk.f32.vlgmr.msra.gmra.mrb[0].mxu1 %vm74_vm2, %v152_v32 }
 0x23c   :  { %v234_v34 = vpop.f32.mrb[0].mxu1 }
 0x23d   :  { %v235_v35 = vadd.f32 %v272_v33, %v234_v34  ;;  %v302_v36 = vpop.f32.mrb[1].mxu1 }
 0x23f   :  { %v238_v38 = vmax.f32 %v235_v35, 0.0 }
 0x241   :  { %v246_v39 = vmul.f32 %v275_v37, %v238_v38 }
 0x243   :  { %v247_v40 = vsel %vm74_vm2, %v246_v39, 0.0 }
 0x244   :  { %248 = vadd.xlane.f32.xlu1 %v247_v40 }
 0x2d1   :  { %v249_v42 = vpop.xlane.xlu1 %248 }
 0x2d2   :  { %v255_v43 = vadd.f32 %v276_v41, %v249_v42 }
 0x2d4   :  { %257 = vst.msk [vmem:[%s420_s6] sm:$0xff] %vm256_vm3, %v255_v43 }

</bundles_post_ra>
